<compile_context>
chip_gen: v6e
topology: v6e:2x2x1
jax: 0.10.0
libtpu: 0.0.40
codegen_flags: <defaults>
</compile_context>

<pallas_src>
import math

import jax
import jax.numpy as jnp
from jax.experimental import pallas as pl
from jax.experimental.pallas import tpu as pltpu

_LANE = 128
_SUBLANE = 8


def _round_up(x, n):
    return ((x + n - 1) // n) * n


def _round_down(x, n):
    return (x // n) * n


def _cdiv(a, b):
    return (a + b - 1) // b


# ---------------------------------------------------------------------------
# Kernel
# ---------------------------------------------------------------------------
def gated_fusion_kernel(x1_ref, x2_ref, w1_ref, w2_ref, b_ref, o_ref):
    tile_n = o_ref.shape[-1]
    col = pl.multiple_of(pl.program_id(1) * tile_n, _LANE)

    x1 = x1_ref[...]
    x2 = x2_ref[...]
    # Linear over the concatenation == sum of two MXU matmuls.
    logits = (
        jnp.dot(x1, w1_ref[...], preferred_element_type=jnp.float32)
        + jnp.dot(x2, w2_ref[...], preferred_element_type=jnp.float32)
        + b_ref[...]
    )
    gate = jax.nn.sigmoid(logits)  # f32, EUP path

    # Column slice of the activations matching this output tile (full view
    # when grid_n == 1).  Aligned to a lane multiple, so it is a cheap vld.
    x1n = x1_ref[:, pl.ds(col, tile_n)].astype(jnp.float32)
    x2n = x2_ref[:, pl.ds(col, tile_n)].astype(jnp.float32)

    # out = gate*x1 + (1-gate)*x2  ==  x2 + gate*(x1 - x2)
    o_ref[...] = (x2n + gate * (x1n - x2n)).astype(o_ref.dtype)


# ---------------------------------------------------------------------------
# One-time parameter packing (do this at model init, not per forward)
# ---------------------------------------------------------------------------
def pack_gated_fusion_params(weight, bias, *, d_pad=None, param_dtype=None):
    """weight: (dim, 2*dim) PyTorch Linear layout; bias: (dim,).

    Returns (w1, w2, bias2d) with w1/w2: (d_pad, d_pad) already transposed for
    `x @ w`, zero-padded, optionally cast (e.g. param_dtype=jnp.bfloat16 halves
    resident VMEM / weight HBM traffic); bias2d: (1, d_pad) f32.
    """
    d = weight.shape[0]
    assert weight.shape == (d, 2 * d)
    if d_pad is None:
        # NOTE: for MXU-bound bf16 regimes on v6e/v7x, rounding to 256 instead
        # of 128 avoids half-empty MXU tiles.
        d_pad = _round_up(d, _LANE)
    if param_dtype is None:
        param_dtype = weight.dtype

    w1 = weight[:, :d].T.astype(param_dtype)   # (d, d)
    w2 = weight[:, d:].T.astype(param_dtype)   # (d, d)
    if d_pad != d:
        w1 = jnp.pad(w1, ((0, d_pad - d), (0, d_pad - d)))
        w2 = jnp.pad(w2, ((0, d_pad - d), (0, d_pad - d)))
    b2 = jnp.pad(bias.astype(jnp.float32), (0, d_pad - d)).reshape(1, d_pad)
    return w1, w2, b2


# ---------------------------------------------------------------------------
# Tile / VMEM budgeting
# ---------------------------------------------------------------------------
def _select_tiles(m, d_pad, act_bytes, w_bytes):
    # N tiling: bound weight VMEM independently of dim.
    resident_w = 2 * d_pad * d_pad * w_bytes            # single-buffered W1+W2
    if resident_w <= 24 * 1024 * 1024:
        tile_n = d_pad
    else:
        # double-buffered streamed W1+W2 blocks should stay <= ~16 MiB
        tile_n = _round_down((16 * 1024 * 1024) // (2 * 2 * d_pad * w_bytes), _LANE)
        tile_n = max(_LANE, min(tile_n, d_pad))
        while d_pad % tile_n:                            # 128 always divides d_pad
            tile_n -= _LANE
    grid_n = d_pad // tile_n

    # M tiling: ~2 MiB per streamed activation block (per the measured
    # 29%->86%-of-roofline curve), clamped to the problem size.
    tile_m = _round_down((2 * 1024 * 1024) // (d_pad * act_bytes), _SUBLANE)
    tile_m = max(_SUBLANE, min(tile_m, 4096, _round_up(m, _SUBLANE)))

    # v7x has 2 TensorCores sharding the grid: make sure there are >= 2 tiles.
    if _cdiv(m, tile_m) < 2 and m > _SUBLANE:
        tile_m = max(_SUBLANE, _round_up(_cdiv(m, 2), _SUBLANE))

    def est(tm):
        wbuf = 1 if grid_n == 1 else 2
        return (2 * 2 * tm * d_pad * act_bytes           # x1, x2 (double-buffered)
                + 2 * tm * tile_n * act_bytes             # out    (double-buffered)
                + wbuf * 2 * d_pad * tile_n * w_bytes     # W1, W2
                + wbuf * _SUBLANE * tile_n * 4            # bias
                + 4 * tm * tile_n * 4)                    # f32 temporaries headroom

    # Keep the working set under ~44 MiB so it fits v7x's 64 MiB/TC (and the
    # explicit vmem_limit below covers v5e/v6e scoped defaults).
    while est(tile_m) > 44 * 1024 * 1024 and tile_m > _SUBLANE:
        tile_m = max(_SUBLANE, _round_down(max(tile_m // 2, _SUBLANE), _SUBLANE))

    return tile_m, tile_n, grid_n, est(tile_m)


# ---------------------------------------------------------------------------
# Wrapper
# ---------------------------------------------------------------------------
def gated_fusion(x1, x2, w1, w2, bias2d):
    """x1, x2: (batch, seq, dim). w1/w2: (d_pad, d_pad) packed. bias2d: (1, d_pad)."""
    assert x1.shape == x2.shape
    b, s, d = x1.shape
    m = b * s
    d_pad = w1.shape[0]
    assert w1.shape == (d_pad, d_pad) and w2.shape == (d_pad, d_pad)
    assert bias2d.shape == (1, d_pad)
    assert d_pad % _LANE == 0 and d_pad >= d

    act_bytes = jnp.dtype(x1.dtype).itemsize
    w_bytes = jnp.dtype(w1.dtype).itemsize
    tile_m, tile_n, grid_n, est = _select_tiles(m, d_pad, act_bytes, w_bytes)
    grid_m = _cdiv(m, tile_m)

    vmem_limit = int(min(64 * 1024 * 1024,
                         max(32 * 1024 * 1024, est * 1.25 + (2 << 20))))

    x1f = x1.reshape(m, d)
    x2f = x2.reshape(m, d)
    if d_pad != d:
        # Zero-pad the contraction columns (needed so padded K columns cannot
        # poison the matmul).  Rows are never padded: Pallas masks the ragged
        # last M block and rows are independent.
        x1f = jnp.pad(x1f, ((0, 0), (0, d_pad - d)))
        x2f = jnp.pad(x2f, ((0, 0), (0, d_pad - d)))

    def _build(single_buffer_weights):
        wmode = {"pipeline_mode": pl.Buffered(1)} if single_buffer_weights else {}
        in_specs = [
            pl.BlockSpec((tile_m, d_pad), lambda i, j: (i, 0)),            # x1 tile
            pl.BlockSpec((tile_m, d_pad), lambda i, j: (i, 0)),            # x2 tile
            pl.BlockSpec((d_pad, tile_n), lambda i, j: (0, j), **wmode),   # W1
            pl.BlockSpec((d_pad, tile_n), lambda i, j: (0, j), **wmode),   # W2
            pl.BlockSpec((1, tile_n), lambda i, j: (0, j), **wmode),       # bias
        ]
        return pl.pallas_call(
            gated_fusion_kernel,
            out_shape=jax.ShapeDtypeStruct((m, d_pad), x1.dtype),
            grid_spec=pltpu.PrefetchScalarGridSpec(
                num_scalar_prefetch=0,
                grid=(grid_m, grid_n),
                in_specs=in_specs,
                out_specs=pl.BlockSpec((tile_m, tile_n), lambda i, j: (i, j)),
            ),
            compiler_params=pltpu.CompilerParams(
                dimension_semantics=("parallel", "parallel"),
                vmem_limit_bytes=vmem_limit,
            ),
        )

    operands = (x1f, x2f, w1, w2, bias2d)
    if grid_n == 1:
        # Weights/bias have a constant index map -> single-buffer them to halve
        # their VMEM footprint.  Fall back to default double-buffering if this
        # jax version does not support pipeline_mode/Buffered(1).
        try:
            out_flat = _build(True)(*operands)
        except Exception:
            out_flat = _build(False)(*operands)
    else:
        out_flat = _build(False)(*operands)

    if d_pad != d:
        out_flat = out_flat[:, :d]
    return out_flat.reshape(b, s, d)


def reference(x1, x2, weight, bias):
    cat = jnp.concatenate([x1, x2], axis=-1)
    gate = jax.nn.sigmoid(cat @ weight.T + bias)
    return gate * x1 + (1.0 - gate) * x2


if __name__ == "__main__":
    batch, seq, dim = 2, 8, 32

    key = jax.random.PRNGKey(0)
    k_x1, k_x2, k_w, k_b = jax.random.split(key, 4)

    x1 = jax.random.normal(k_x1, (batch, seq, dim), dtype=jnp.float32)
    x2 = jax.random.normal(k_x2, (batch, seq, dim), dtype=jnp.float32)

    # Deterministic init matching nn.Linear(dim*2, dim): U(-1/sqrt(fan_in), ...)
    fan_in = 2 * dim
    bound = 1.0 / math.sqrt(fan_in)
    weight = jax.random.uniform(k_w, (dim, 2 * dim), minval=-bound, maxval=bound,
                                dtype=jnp.float32)
    bias = jax.random.uniform(k_b, (dim,), minval=-bound, maxval=bound,
                              dtype=jnp.float32)

    # Pack once (init-time): transpose + pad + (optionally) cast the weights.
    w1, w2, b2 = pack_gated_fusion_params(weight, bias)

    out = gated_fusion(x1, x2, w1, w2, b2)
    out = jax.block_until_ready(out)

    ref = reference(x1, x2, weight, bias)
    assert out.shape == (batch, seq, dim)
    assert jnp.allclose(out, ref, atol=1e-5, rtol=1e-5)

    print("KERNEL_OK")
</pallas_src>

<mosaic_0001>
module attributes {stable_mosaic.version = 11 : i64} {
  func.func @gated_fusion_kernel(%arg0: i32, %arg1: i32, %arg2: memref<8x128xf32, #tpu.memory_space<vmem>>, %arg3: memref<8x128xf32, #tpu.memory_space<vmem>>, %arg4: memref<128x128xf32, #tpu.memory_space<vmem>>, %arg5: memref<128x128xf32, #tpu.memory_space<vmem>>, %arg6: memref<1x128xf32, #tpu.memory_space<vmem>>, %arg7: memref<8x128xf32, #tpu.memory_space<vmem>>) attributes {dimension_semantics = [#tpu.dimension_semantics<parallel>, #tpu.dimension_semantics<parallel>], iteration_bounds = array<i64: 2, 1>, scalar_prefetch = 0 : i64, scratch_operands = 0 : i64, tpu.core_type = #tpu.core_type<tc>, window_params = [{transform_indices = @transform_0, window_bounds = array<i64: 8, 128>}, {transform_indices = @transform_1, window_bounds = array<i64: 8, 128>}, {pipeline_mode = #tpu.pipeline_mode<synchronous>, transform_indices = @transform_2, window_bounds = array<i64: 128, 128>}, {pipeline_mode = #tpu.pipeline_mode<synchronous>, transform_indices = @transform_3, window_bounds = array<i64: 128, 128>}, {pipeline_mode = #tpu.pipeline_mode<synchronous>, transform_indices = @transform_4, window_bounds = array<i64: 1, 128>}, {transform_indices = @transform_5, window_bounds = array<i64: 8, 128>}]} {
    %c128_i32 = arith.constant 128 : i32
    %0 = arith.muli %arg1, %c128_i32 : i32
    %1 = tpu.assume_multiple %0, 128 : i32
    %c0 = arith.constant 0 : index
    %c0_0 = arith.constant 0 : index
    %2 = vector.load %arg2[%c0, %c0_0] : memref<8x128xf32, #tpu.memory_space<vmem>>, vector<8x128xf32>
    %c0_1 = arith.constant 0 : index
    %c0_2 = arith.constant 0 : index
    %3 = vector.load %arg3[%c0_1, %c0_2] : memref<8x128xf32, #tpu.memory_space<vmem>>, vector<8x128xf32>
    %c0_3 = arith.constant 0 : index
    %c0_4 = arith.constant 0 : index
    %4 = vector.load %arg4[%c0_3, %c0_4] : memref<128x128xf32, #tpu.memory_space<vmem>>, vector<128x128xf32>
    %cst = arith.constant dense<0.000000e+00> : vector<8x128xf32>
    %5 = tpu.matmul %2, %4, %cst {dimension_numbers = #tpu.dot_dimension_numbers<[1], [0], [0], [1], [0, 0, 1, 1], [], []>} : vector<8x128xf32>, vector<128x128xf32>, vector<8x128xf32> -> vector<8x128xf32>
    %c0_5 = arith.constant 0 : index
    %c0_6 = arith.constant 0 : index
    %6 = vector.load %arg5[%c0_5, %c0_6] : memref<128x128xf32, #tpu.memory_space<vmem>>, vector<128x128xf32>
    %cst_7 = arith.constant dense<0.000000e+00> : vector<8x128xf32>
    %7 = tpu.matmul %3, %6, %cst_7 {dimension_numbers = #tpu.dot_dimension_numbers<[1], [0], [0], [1], [0, 0, 1, 1], [], []>} : vector<8x128xf32>, vector<128x128xf32>, vector<8x128xf32> -> vector<8x128xf32>
    %8 = arith.addf %5, %7 : vector<8x128xf32>
    %c0_8 = arith.constant 0 : index
    %c0_9 = arith.constant 0 : index
    %9 = vector.load %arg6[%c0_8, %c0_9] : memref<1x128xf32, #tpu.memory_space<vmem>>, vector<1x128xf32>
    %10 = vector.broadcast %9 : vector<1x128xf32> to vector<8x128xf32>
    %11 = arith.addf %8, %10 : vector<8x128xf32>
    %12 = arith.negf %11 : vector<8x128xf32>
    %13 = math.exp %12 : vector<8x128xf32>
    %cst_10 = arith.constant 1.000000e+00 : f32
    %14 = vector.broadcast %cst_10 : f32 to vector<8x128xf32>
    %15 = arith.addf %14, %13 : vector<8x128xf32>
    %16 = arith.divf %14, %15 : vector<8x128xf32>
    %c0_11 = arith.constant 0 : index
    %17 = arith.index_cast %1 : i32 to index
    %18 = vector.load %arg2[%c0_11, %17] : memref<8x128xf32, #tpu.memory_space<vmem>>, vector<8x128xf32>
    %c0_12 = arith.constant 0 : index
    %19 = arith.index_cast %1 : i32 to index
    %20 = vector.load %arg3[%c0_12, %19] : memref<8x128xf32, #tpu.memory_space<vmem>>, vector<8x128xf32>
    %21 = arith.subf %18, %20 : vector<8x128xf32>
    %22 = arith.mulf %16, %21 : vector<8x128xf32>
    %23 = arith.addf %20, %22 : vector<8x128xf32>
    %c0_13 = arith.constant 0 : index
    %c0_14 = arith.constant 0 : index
    %24 = vector.load %arg7[%c0_13, %c0_14] : memref<8x128xf32, #tpu.memory_space<vmem>>, vector<8x128xf32>
    tpu.vector_store %arg7[%c0_13, %c0_14], %23 {strides = array<i32>} : memref<8x128xf32, #tpu.memory_space<vmem>>, vector<8x128xf32>,
    return
  }
  func.func @transform_0(%arg0: i32, %arg1: i32) -> (i32, i32) {
    %c0_i32 = arith.constant 0 : i32
    %c0_i32_0 = arith.constant 0 : i32
    return %arg0, %c0_i32 : i32, i32
  }
  func.func @transform_1(%arg0: i32, %arg1: i32) -> (i32, i32) {
    %c0_i32 = arith.constant 0 : i32
    %c0_i32_0 = arith.constant 0 : i32
    return %arg0, %c0_i32 : i32, i32
  }
  func.func @transform_2(%arg0: i32, %arg1: i32) -> (i32, i32) {
    %c0_i32 = arith.constant 0 : i32
    %c0_i32_0 = arith.constant 0 : i32
    return %c0_i32, %arg1 : i32, i32
  }
  func.func @transform_3(%arg0: i32, %arg1: i32) -> (i32, i32) {
    %c0_i32 = arith.constant 0 : i32
    %c0_i32_0 = arith.constant 0 : i32
    return %c0_i32, %arg1 : i32, i32
  }
  func.func @transform_4(%arg0: i32, %arg1: i32) -> (i32, i32) {
    %c0_i32 = arith.constant 0 : i32
    %c0_i32_0 = arith.constant 0 : i32
    return %c0_i32, %arg1 : i32, i32
  }
  func.func @transform_5(%arg0: i32, %arg1: i32) -> (i32, i32) {
    %c0_i32 = arith.constant 0 : i32
    return %arg0, %arg1 : i32, i32
  }
}

module attributes {stable_mosaic.version = 11 : i64} {
  func.func @gated_fusion_kernel(%arg0: i32, %arg1: i32, %arg2: memref<8x128xf32, #tpu.memory_space<vmem>>, %arg3: memref<8x128xf32, #tpu.memory_space<vmem>>, %arg4: memref<128x128xf32, #tpu.memory_space<vmem>>, %arg5: memref<128x128xf32, #tpu.memory_space<vmem>>, %arg6: memref<1x128xf32, #tpu.memory_space<vmem>>, %arg7: memref<8x128xf32, #tpu.memory_space<vmem>>) attributes {dimension_semantics = [#tpu.dimension_semantics<parallel>, #tpu.dimension_semantics<parallel>], iteration_bounds = array<i64: 2, 1>, scalar_prefetch = 0 : i64, scratch_operands = 0 : i64, tpu.core_type = #tpu.core_type<tc>, window_params = [{transform_indices = @transform_0, window_bounds = array<i64: 8, 128>}, {transform_indices = @transform_1, window_bounds = array<i64: 8, 128>}, {transform_indices = @transform_2, window_bounds = array<i64: 128, 128>}, {transform_indices = @transform_3, window_bounds = array<i64: 128, 128>}, {transform_indices = @transform_4, window_bounds = array<i64: 1, 128>}, {transform_indices = @transform_5, window_bounds = array<i64: 8, 128>}]} {
    %c128_i32 = arith.constant 128 : i32
    %0 = arith.muli %arg1, %c128_i32 : i32
    %1 = tpu.assume_multiple %0, 128 : i32
    %c0 = arith.constant 0 : index
    %c0_0 = arith.constant 0 : index
    %2 = vector.load %arg2[%c0, %c0_0] : memref<8x128xf32, #tpu.memory_space<vmem>>, vector<8x128xf32>
    %c0_1 = arith.constant 0 : index
    %c0_2 = arith.constant 0 : index
    %3 = vector.load %arg3[%c0_1, %c0_2] : memref<8x128xf32, #tpu.memory_space<vmem>>, vector<8x128xf32>
    %c0_3 = arith.constant 0 : index
    %c0_4 = arith.constant 0 : index
    %4 = vector.load %arg4[%c0_3, %c0_4] : memref<128x128xf32, #tpu.memory_space<vmem>>, vector<128x128xf32>
    %cst = arith.constant dense<0.000000e+00> : vector<8x128xf32>
    %5 = tpu.matmul %2, %4, %cst {dimension_numbers = #tpu.dot_dimension_numbers<[1], [0], [0], [1], [0, 0, 1, 1], [], []>} : vector<8x128xf32>, vector<128x128xf32>, vector<8x128xf32> -> vector<8x128xf32>
    %c0_5 = arith.constant 0 : index
    %c0_6 = arith.constant 0 : index
    %6 = vector.load %arg5[%c0_5, %c0_6] : memref<128x128xf32, #tpu.memory_space<vmem>>, vector<128x128xf32>
    %cst_7 = arith.constant dense<0.000000e+00> : vector<8x128xf32>
    %7 = tpu.matmul %3, %6, %cst_7 {dimension_numbers = #tpu.dot_dimension_numbers<[1], [0], [0], [1], [0, 0, 1, 1], [], []>} : vector<8x128xf32>, vector<128x128xf32>, vector<8x128xf32> -> vector<8x128xf32>
    %8 = arith.addf %5, %7 : vector<8x128xf32>
    %c0_8 = arith.constant 0 : index
    %c0_9 = arith.constant 0 : index
    %9 = vector.load %arg6[%c0_8, %c0_9] : memref<1x128xf32, #tpu.memory_space<vmem>>, vector<1x128xf32>
    %10 = vector.broadcast %9 : vector<1x128xf32> to vector<8x128xf32>
    %11 = arith.addf %8, %10 : vector<8x128xf32>
    %12 = arith.negf %11 : vector<8x128xf32>
    %13 = math.exp %12 : vector<8x128xf32>
    %cst_10 = arith.constant 1.000000e+00 : f32
    %14 = vector.broadcast %cst_10 : f32 to vector<8x128xf32>
    %15 = arith.addf %14, %13 : vector<8x128xf32>
    %16 = arith.divf %14, %15 : vector<8x128xf32>
    %c0_11 = arith.constant 0 : index
    %17 = arith.index_cast %1 : i32 to index
    %18 = vector.load %arg2[%c0_11, %17] : memref<8x128xf32, #tpu.memory_space<vmem>>, vector<8x128xf32>
    %c0_12 = arith.constant 0 : index
    %19 = arith.index_cast %1 : i32 to index
    %20 = vector.load %arg3[%c0_12, %19] : memref<8x128xf32, #tpu.memory_space<vmem>>, vector<8x128xf32>
    %21 = arith.subf %18, %20 : vector<8x128xf32>
    %22 = arith.mulf %16, %21 : vector<8x128xf32>
    %23 = arith.addf %20, %22 : vector<8x128xf32>
    %c0_13 = arith.constant 0 : index
    %c0_14 = arith.constant 0 : index
    %24 = vector.load %arg7[%c0_13, %c0_14] : memref<8x128xf32, #tpu.memory_space<vmem>>, vector<8x128xf32>
    tpu.vector_store %arg7[%c0_13, %c0_14], %23 {strides = array<i32>} : memref<8x128xf32, #tpu.memory_space<vmem>>, vector<8x128xf32>,
    return
  }
  func.func @transform_0(%arg0: i32, %arg1: i32) -> (i32, i32) {
    %c0_i32 = arith.constant 0 : i32
    %c0_i32_0 = arith.constant 0 : i32
    return %arg0, %c0_i32 : i32, i32
  }
  func.func @transform_1(%arg0: i32, %arg1: i32) -> (i32, i32) {
    %c0_i32 = arith.constant 0 : i32
    %c0_i32_0 = arith.constant 0 : i32
    return %arg0, %c0_i32 : i32, i32
  }
  func.func @transform_2(%arg0: i32, %arg1: i32) -> (i32, i32) {
    %c0_i32 = arith.constant 0 : i32
    %c0_i32_0 = arith.constant 0 : i32
    return %c0_i32, %arg1 : i32, i32
  }
  func.func @transform_3(%arg0: i32, %arg1: i32) -> (i32, i32) {
    %c0_i32 = arith.constant 0 : i32
    %c0_i32_0 = arith.constant 0 : i32
    return %c0_i32, %arg1 : i32, i32
  }
  func.func @transform_4(%arg0: i32, %arg1: i32) -> (i32, i32) {
    %c0_i32 = arith.constant 0 : i32
    %c0_i32_0 = arith.constant 0 : i32
    return %c0_i32, %arg1 : i32, i32
  }
  func.func @transform_5(%arg0: i32, %arg1: i32) -> (i32, i32) {
    %c0_i32 = arith.constant 0 : i32
    return %arg0, %arg1 : i32, i32
  }
}

</mosaic_0001>

<bundles_post_ra>
// kernel: tpu_custom_call.1
= control target key start
LH: loop header
LB: loop body
LE: loop exit
PB: predicated region body
PF: predicated region fallthrough
CT: control target
= control target key end

     0   :  { %s1405_s0 = inlined_call_operand.hbm [shape: f32[16,128], index: 0, kind: input, shape index: {}]   ;;  %s1406_s1 = inlined_call_operand.hbm [shape: f32[16,128], index: 1, kind: input, shape index: {}]   ;;  %s1407_s2 = inlined_call_operand.hbm [shape: f32[128,128], index: 2, kind: input, shape index: {}]   ;;  %s1408_s3 = inlined_call_operand.hbm [shape: f32[128,128], index: 3, kind: input, shape index: {}]   ;;  %s1409_s4 = inlined_call_operand.vmem [shape: f32[1,128], index: 4, kind: input, shape index: {}]   ;;  %s1410_s5 = inlined_call_operand.hbm [shape: f32[16,128], index: 5, kind: output, shape index: {}]  }
   0x1   :  { %1412 = sst [smem:[#allocation16_spill]] %s1405_s0 }
   0x2   :  { %1413 = sst [smem:[#allocation17_spill]] %s1406_s1 }
   0x3   :  { %1414 = sst [smem:[#allocation18_spill]] %s1407_s2 }
   0x4   :  { %10 = vsyncpa [#allocation3], 0 }
   0x5   :  { %12 = vsyncpa [#allocation3 + $0x1], 0 }
   0x6   :  { %13 = vsyncpa [#allocation6], 0 }
   0x7   :  { %15 = vsyncpa [#allocation6 + $0x1], 0 }
   0x8   :  { %16 = vsyncpa [#allocation9], 0 }
   0x9   :  { %17 = vsyncpa [#allocation4], 0 }
   0xa   :  { %19 = vsyncpa [#allocation4 + $0x1], 0  ;;  %s1165_s18 = smov 0   ;;  %s1167_s19 = smov 0  }
   0xb   :  { %s1169_s20 = smov 0   ;;  %s1171_s21 = smov 0  }
   0xc   :  { %s1173_s22 = smov 0   ;;  %s1175_s23 = smov 0  }
   0xd LB: > { %s1196_s24 = sadd.s32 4294967295, %s1124_s23   ;;  %s702_s25 = sadd.s32 4294967294, %s1124_s23   ;;  %s1124_s23 = sphi %s1175_s23, %s25_s23   ;;  %s1120_s22 = sphi %s1173_s22, %s1435_s22   ;;  %s1116_s21 = sphi %s1171_s21, %s1434_s21   ;;  %s1112_s20 = sphi %s1169_s20, %s1433_s20   ;;  %s1108_s19 = sphi %s1167_s19, %s1432_s19   ;;  %s1104_s18 = sphi %s1165_s18, %s1431_s18  }
   0xe   : > { %p57_p0 = scmp.ne.s32.totalorder %s1108_s19, %s1104_s18  ;;  %p1411_p1 = scmp.eq.s32.totalorder %s1196_s24, 0 }
   0xf   : > { %p193_p3 = scmp.eq.s32.totalorder %s702_s25, 1  ;;  %p703_p5 = scmp.ge.s32.totalorder %s1124_s23, 1 }
  0x10   : > { %p1205_p4 = por %p1411_p1, %p57_p0  ;;  %p200_p7 = scmp.lt.s32.totalorder %s1124_s23, 3 }
  0x11   : > { %p1210_p6 = por %p193_p3, %p57_p0  ;;  %s1126_s29 = smov [#allocation7]  }
  0x12   : > { %p1215_p8 = pnand %p703_p5, %p200_p7  ;;  %s214_s30 = sshll.u32 %s1126_s29, 4  ;;  %s215_s30 = int_to_ptr.vmem [resolvable:$true] %s214_s30 }
  0x13   : > { %s1416_s27 = scalar_select %p1210_p6, 1, 0 }
  0x14   : > { %p842_p9 = pneg %p1215_p8  ;;  %s1127_s7 = smov [#allocation8]  }
  0x15   : > { %s229_s8 = sshll.u32 %s1127_s7, 4  ;;  %s935_s9 = scalar_lea.vmem %s215_s30, 2048  ;;  %s230_s8 = int_to_ptr.vmem [resolvable:$true] %s229_s8 }
  0x16   : > { %p1224_p11 = pnand %p842_p9, %p1411_p1  ;;  %p936_p13 = scmp.ne.s32.totalorder %s215_s30, %s935_s9 }
  0x17   : > { %p943_p5 = scmp.lt.s32.totalorder %s215_s30, %s215_s30  ;;  %p944_p7 = scmp.lt.s32.totalorder %s935_s9, %s935_s9 }
  0x18   : > { %p926_p12 = pneg %p1224_p11 }
  0x19   : > { %p945_p10 = por %p944_p7, %p943_p5 }
  0x1a   : > { %p938_p0 = pnand %p936_p13, %p926_p12 }
  0x1c   : > { %p939_p3 = pneg %p938_p0 }
  0x1e   : > { %p946_p9 = pnand %p945_p10, %p939_p3 }
  0x20   : > { %949 = shalt.err (!%p946_p9)
}
  0x21   : > { %s1128_s10 = smov 128   ;;  %s1129_s11 = smov 8  }
  0x22   : > { %s1419_s2 = sld [smem:[#allocation18_spill]]  ;;  %s961_s14 = scalar_lea.vmem %s230_s8, 2048 }
  0x23   : > { %p962_p1 = scmp.ne.s32.totalorder %s230_s8, %s961_s14  ;;  %p969_p2 = scmp.lt.s32.totalorder %s230_s8, %s230_s8 }
  0x24   : > { %p970_p6 = scmp.lt.s32.totalorder %s961_s14, %s961_s14 }
  0x25   : > { %p964_p13 = pnand %p962_p1, %p926_p12 }
  0x26   : > { %p971_p5 = por %p970_p6, %p969_p2 }
  0x27   : > { %p965_p0 = pneg %p964_p13 }
  0x28   : > { %845 = dma.hbm_to_vmem [thread:$0]  (!%p1224_p11), %s1419_s2, 2048, %s215_s30, [#allocation6], %s1128_s10, %s1128_s10, %s1129_s11  }
  0x29   : > { %p972_p10 = pnand %p971_p5, %p965_p0 }
  0x2b   : > { %975 = shalt.err (!%p972_p10)
}
  0x2c   : > { %848 = dma.hbm_to_vmem [thread:$0]  (!%p1224_p11), %s1408_s3, 2048, %s230_s8, [#allocation9], %s1128_s10, %s1128_s10, %s1129_s11  }
  0x2d   : > { %s37_s17 = sadd.s32 1, %s1120_s22  ;;  %s44_s25 = sadd.s32 1, %s1112_s20 }
  0x2e   : > { %p39_p1 = scmp.ge.s32.totalorder %s37_s17, 2  ;;  %p51_p2 = scmp.ne.s32.totalorder %s1112_s20, %s1108_s19 }
  0x2f   : > { %p52_p6 = scmp.eq.s32.totalorder %s1124_s23, 0  ;;  %p862_p12 = scmp.lt.s32.totalorder %s1124_s23, 2 }
  0x30   : > { %s1437_s17 = smov (%p39_p1, %s37_s17), 0  ;;  %p1420_p7 = scmp.eq.s32.totalorder %s1196_s24, 1 }
  0x31   : > { %p53_p3 = por %p52_p6, %p51_p2  ;;  %s41_s30 = ssub.s32 %s1120_s22, %s1437_s17 }
  0x32   : > { %p1256_p9 = por %p1420_p7, %p51_p2  ;;  %s249_s6 = sand.u32 1, %s1112_s20  }
  0x33   : > { %p42_p13 = scmp.eq.s32.totalorder %s41_s30, 0  ;;  %s708_s7 = sshll.u32 %s249_s6, 3 }
  0x34   : > { %s709_s8 = sshll.u32 %s1120_s22, 7  ;;  %s1422_s0 = sld [smem:[#allocation16_spill]] }
  0x35   : > { %s1265_s9 = scalar_select %p42_p13, %s1112_s20, %s44_s25  }
  0x36   : > { %s253_s13 = scalar_lea.vmem [#allocation2], %s708_s7  ;;  %p1272_p11 = pnand %p862_p12, %p53_p3 }
  0x37   : > { %s260_s14 = sshll.u32 %s253_s13, 4  ;;  %s1424_s1 = sld [smem:[#allocation17_spill]]  ;;  %s261_s14 = int_to_ptr.vmem [resolvable:$true] %s260_s14 }
  0x38   : > { %s250_s25 = scalar_lea.sflag [#allocation3], %s249_s6  ;;  %p978_p0 = pneg %p1272_p11 }
  0x39   : > { %s989_s10 = scalar_lea.vmem %s261_s14, 128  ;;  %s1130_s11 = smov [#allocation2]  }
  0x3a   : > { %s258_s12 = scalar_lea.hbm %s1422_s0, %s709_s8  ;;  %p990_p5 = scmp.ne.s32.totalorder %s261_s14, %s989_s10 }
  0x3b   : > { %s994_s13 = sshll.u32 %s1130_s11, 4  ;;  %s995_s13 = int_to_ptr.vmem [resolvable:$false] %s994_s13 }
  0x3c   : > { %p992_p10 = pnand %p990_p5, %p978_p0  ;;  %s996_s0 = scalar_lea.vmem %s995_s13, 256 }
  0x3d   : > { %s1279_s2 = scalar_lea.hbm %s1424_s1, %s709_s8  ;;  %p997_p2 = scmp.lt.s32.totalorder %s261_s14, %s995_s13 }
  0x3e   : > { %p993_p1 = pneg %p992_p10  ;;  %p998_p6 = scmp.lt.s32.totalorder %s996_s0, %s989_s10 }
  0x40   : > { %p999_p12 = por %p998_p6, %p997_p2 }
  0x42   : > { %p1000_p3 = pnand %p999_p12, %p993_p1 }
  0x44   : > { %1003 = shalt.err (!%p1000_p3)
}
  0x45   : > { %852 = dma.hbm_to_vmem [thread:$0]  (!%p1272_p11), %s258_s12, 128, %s261_s14, %s250_s25  }
  0x46   : > { %s267_s6 = sand.u32 1, %s1124_s23   ;;  %s271_s8 = scalar_lea.vmem [#allocation5], %s708_s7 }
  0x47   : > { %s278_s16 = sshll.u32 %s271_s8, 4  ;;  %s268_s30 = scalar_lea.sflag [#allocation6], %s267_s6  ;;  %s279_s16 = int_to_ptr.vmem [resolvable:$true] %s278_s16 }
  0x48   : > { %s1017_s1 = scalar_lea.vmem %s279_s16, 128  ;;  %s1131_s0 = smov [#allocation5]  }
  0x49   : > { %p1018_p7 = scmp.ne.s32.totalorder %s279_s16, %s1017_s1  ;;  %s1022_s10 = sshll.u32 %s1131_s0, 4  ;;  %s1023_s10 = int_to_ptr.vmem [resolvable:$false] %s1022_s10 }
  0x4a   : > { %s1024_s11 = scalar_lea.vmem %s1023_s10, 256  ;;  %p1025_p10 = scmp.lt.s32.totalorder %s279_s16, %s1023_s10 }
  0x4b   : > { %p1020_p13 = pnand %p1018_p7, %p978_p0  ;;  %p1026_p1 = scmp.lt.s32.totalorder %s1024_s11, %s1017_s1 }
  0x4d   : > { %p1021_p5 = pneg %p1020_p13  ;;  %p1027_p2 = por %p1026_p1, %p1025_p10 }
  0x4f   : > { %p1028_p6 = pnand %p1027_p2, %p1021_p5 }
  0x51   : > { %1031 = shalt.err (!%p1028_p6)
}
  0x52   : > { %855 = dma.hbm_to_vmem [thread:$0]  (!%p1272_p11), %s1279_s2, 128, %s279_s16, %s268_s30  }
  0x53   : > { %287 = sbr.rel (%p1215_p8) target bundleno = 378 (0x17a), region = 40  ;;  %s1298_s7 = sand.u32 (!%p1215_p8), 1, %s1108_s19  }
  0x54   : > { %s1301_s12 = sshll.u32 (!%p1215_p8), %s1298_s7, 3  ;;  %s290_s1 = scalar_lea.sflag (!%p1215_p8), [#allocation3], %s1298_s7 }
  0x55   : > { %s293_s14 = scalar_lea.vmem (!%p1215_p8), [#allocation2], %s1301_s12 }
  0x58   : > { %1083 = dma.done.wait (%p1205_p4), %s290_s1, 128  }
  0x59   : > { %1085 = vsyncadd (%p1205_p4), %s290_s1, 4294967168  ;;  %s298_s2 = sand.u32 1, %s1196_s24   ;;  %s302_s15 = scalar_lea.vmem [#allocation5], %s1301_s12 }
  0x5a   : > { %s299_s28 = scalar_lea.sflag [#allocation6], %s298_s2 }
  0x5b   : > { %1087 = dma.done.wait (%p1205_p4), %s299_s28, 128  }
  0x5c   : > { %1089 = vsyncadd (%p1205_p4), %s299_s28, 4294967168  ;;  %p1425_p8 = scmp.eq.s32.totalorder %s1196_s24, 0 }
  0x5e   : > { %1091 = dma.done.wait (%p1425_p8), [#allocation6], 2048   ;;  %p1426_p11 = pmov %p1425_p8 }
  0x5f   : > { %p1427_p0 = pmov %p1425_p8 }
  0x60   : > { %1093 = vsyncadd (%p1426_p11), [#allocation6], 4294965248 }
  0x61   : > { %1095 = dma.done.wait (%p1427_p0), [#allocation9], 2048   ;;  %p1428_p12 = pmov %p1427_p0 }
  0x62   : > { %v1132_v0 = vmov 0.0   ;;  %vm1133_vm0 = vmmov 0   ;;  %v382_v1 = vld [vmem:[#allocation8 + $0x78] sm:$0xff]  ;;  %v381_v3 = vld [vmem:[#allocation8 + $0x70] sm:$0xff]  ;;  %v380_v5 = vld [vmem:[#allocation8 + $0x68] sm:$0xff]  ;;  %s721_s25 = sshll.u32 %s1116_s21, 7 }
  0x63   : > { %1097 = vsyncadd (%p1428_p12), [#allocation9], 4294965248  ;;  %758 = vmatprep.subr.mxu0 %v1132_v0  ;;  %793 = vmatprep.subr.mxu1 %v1132_v0  ;;  %v366_v2 = vld [vmem:[#allocation7 + $0x78] sm:$0xff]  ;;  %v365_v4 = vld [vmem:[#allocation7 + $0x70] sm:$0xff]  ;;  %s344_s13 = scalar_lea.vmem [#allocation10], %s1301_s12  ;;  %s560_s30 = scalar_lea.hbm %s1410_s5, %s721_s25 }
  0x64   : > { %790 = vmatprep.mubr.msk.f32.mxu0 %vm1133_vm0, %v1132_v0  ;;  %825 = vmatprep.mubr.msk.f32.mxu1 %vm1133_vm0, %v1132_v0  ;;  %v364_v6 = vld [vmem:[#allocation7 + $0x68] sm:$0xff]  ;;  %v379_v7 = vld [vmem:[#allocation8 + $0x60] sm:$0xff]  ;;  %v378_v9 = vld [vmem:[#allocation8 + $0x58] sm:$0xff]  ;;  %s562_s6 = sshll.u32 %s344_s13, 4  ;;  %s548_s0 = scalar_lea.sflag [#allocation4], %s1298_s7  ;;  %s563_s6 = int_to_ptr.vmem [resolvable:$true] %s562_s6 }
  0x65   : > { %759 = vmatpush3.msra.mxu0 %v382_v1  ;;  %794 = vmatpush3.msra.mxu1 %v366_v2  ;;  %v363_v8 = vld [vmem:[#allocation7 + $0x60] sm:$0xff]  ;;  %v362_v10 = vld [vmem:[#allocation7 + $0x58] sm:$0xff]  ;;  %v377_v11 = vld [vmem:[#allocation8 + $0x50] sm:$0xff]  ;;  %s1032_s10 = scalar_lea.vmem %s563_s6, 128  ;;  %s1134_s11 = smov [#allocation10]  }
  0x66   : > { %760 = vmatprep.subr.mxu0 %v1132_v0  ;;  %795 = vmatprep.subr.mxu1 %v1132_v0  ;;  %v361_v12 = vld [vmem:[#allocation7 + $0x50] sm:$0xff]  ;;  %v376_v13 = vld [vmem:[#allocation8 + $0x48] sm:$0xff]  ;;  %v375_v15 = vld [vmem:[#allocation8 + $0x40] sm:$0xff]  ;;  %p1033_p4 = scmp.ne.s32.totalorder %s563_s6, %s1032_s10  ;;  %s1036_s1 = sshll.u32 %s1134_s11, 4  ;;  %s1037_s1 = int_to_ptr.vmem [resolvable:$false] %s1036_s1 }
  0x67   : > { %761 = vmatpush3.msra.mxu0 %v381_v3  ;;  %796 = vmatpush3.msra.mxu1 %v365_v4  ;;  %v360_v14 = vld [vmem:[#allocation7 + $0x48] sm:$0xff]  ;;  %v359_v16 = vld [vmem:[#allocation7 + $0x40] sm:$0xff]  ;;  %v374_v17 = vld [vmem:[#allocation8 + $0x38] sm:$0xff]  ;;  %s1038_s21 = scalar_lea.vmem %s1037_s1, 256  ;;  %p1039_p13 = scmp.lt.s32.totalorder %s563_s6, %s1037_s1 }
  0x68   : > { %762 = vmatprep.subr.mxu0 %v1132_v0  ;;  %797 = vmatprep.subr.mxu1 %v1132_v0  ;;  %v358_v18 = vld [vmem:[#allocation7 + $0x38] sm:$0xff]  ;;  %v373_v19 = vld [vmem:[#allocation8 + $0x30] sm:$0xff]  ;;  %v372_v21 = vld [vmem:[#allocation8 + $0x28] sm:$0xff]  ;;  %p1034_p3 = pnand %p1033_p4, %p1256_p9  ;;  %p1040_p5 = scmp.lt.s32.totalorder %s1038_s21, %s1032_s10 }
  0x69   : > { %763 = vmatpush3.msra.mxu0 %v380_v5  ;;  %798 = vmatpush3.msra.mxu1 %v364_v6  ;;  %v357_v20 = vld [vmem:[#allocation7 + $0x30] sm:$0xff]  ;;  %v356_v22 = vld [vmem:[#allocation7 + $0x28] sm:$0xff]  ;;  %v371_v23 = vld [vmem:[#allocation8 + $0x20] sm:$0xff] }
  0x6a   : > { %764 = vmatprep.subr.mxu0 %v1132_v0  ;;  %799 = vmatprep.subr.mxu1 %v1132_v0  ;;  %v355_v24 = vld [vmem:[#allocation7 + $0x20] sm:$0xff]  ;;  %v370_v25 = vld [vmem:[#allocation8 + $0x18] sm:$0xff]  ;;  %v369_v27 = vld [vmem:[#allocation8 + $0x10] sm:$0xff]  ;;  %p1035_p7 = pneg %p1034_p3  ;;  %p1041_p10 = por %p1040_p5, %p1039_p13 }
  0x6b   : > { %765 = vmatpush3.msra.mxu0 %v379_v7  ;;  %800 = vmatpush3.msra.mxu1 %v363_v8  ;;  %v354_v26 = vld [vmem:[#allocation7 + $0x18] sm:$0xff]  ;;  %v353_v28 = vld [vmem:[#allocation7 + $0x10] sm:$0xff]  ;;  %v368_v29 = vld [vmem:[#allocation8 + $0x8] sm:$0xff] }
  0x6c   : > { %766 = vmatprep.subr.mxu0 %v1132_v0  ;;  %801 = vmatprep.subr.mxu1 %v1132_v0  ;;  %v352_v30 = vld [vmem:[#allocation7 + $0x8] sm:$0xff]  ;;  %v367_v31 = vld [vmem:[#allocation8] sm:$0xff]  ;;  %v350_v33 = vld [vmem:[%s302_s15] sm:$0xff]  ;;  %p1042_p1 = pnand %p1041_p10, %p1035_p7 }
  0x6d   : > { %767 = vmatpush3.msra.mxu0 %v378_v9  ;;  %802 = vmatpush3.msra.mxu1 %v362_v10  ;;  %v351_v32 = vld [vmem:[#allocation7] sm:$0xff] }
  0x6e   : > { %768 = vmatprep.subr.mxu0 %v1132_v0  ;;  %803 = vmatprep.subr.mxu1 %v1132_v0  ;;  %v349_v34 = vld [vmem:[%s293_s14] sm:$0xff] }
  0x6f   : > { %769 = vmatpush3.msra.mxu0 %v377_v11  ;;  %804 = vmatpush3.msra.mxu1 %v361_v12  ;;  %v718_v37 = vld [vmem:[%s1409_s4] ss:$0 sm:$0xff]  ;;  %v543_v45 = vsub.f32 %v349_v34, %v350_v33 }
  0x70   : > { %770 = vmatprep.subr.mxu0 %v1132_v0  ;;  %805 = vmatprep.subr.mxu1 %v1132_v0 }
  0x71   : > { %771 = vmatpush3.msra.mxu0 %v376_v13  ;;  %806 = vmatpush3.msra.mxu1 %v360_v14 }
  0x72   : > { %772 = vmatprep.subr.mxu0 %v1132_v0  ;;  %807 = vmatprep.subr.mxu1 %v1132_v0 }
  0x73   : > { %773 = vmatpush3.msra.mxu0 %v375_v15  ;;  %808 = vmatpush3.msra.mxu1 %v359_v16 }
  0x74   : > { %774 = vmatprep.subr.mxu0 %v1132_v0  ;;  %809 = vmatprep.subr.mxu1 %v1132_v0 }
  0x75   : > { %775 = vmatpush3.msra.mxu0 %v374_v17  ;;  %810 = vmatpush3.msra.mxu1 %v358_v18 }
  0x76   : > { %776 = vmatprep.subr.mxu0 %v1132_v0  ;;  %811 = vmatprep.subr.mxu1 %v1132_v0 }
  0x77   : > { %777 = vmatpush3.msra.mxu0 %v373_v19  ;;  %812 = vmatpush3.msra.mxu1 %v357_v20 }
  0x78   : > { %778 = vmatprep.subr.mxu0 %v1132_v0  ;;  %813 = vmatprep.subr.mxu1 %v1132_v0 }
  0x79   : > { %779 = vmatpush3.msra.mxu0 %v372_v21  ;;  %814 = vmatpush3.msra.mxu1 %v356_v22 }
  0x7a   : > { %780 = vmatprep.subr.mxu0 %v1132_v0  ;;  %815 = vmatprep.subr.mxu1 %v1132_v0 }
  0x7b   : > { %781 = vmatpush3.msra.mxu0 %v371_v23  ;;  %816 = vmatpush3.msra.mxu1 %v355_v24 }
  0x7c   : > { %782 = vmatprep.subr.mxu0 %v1132_v0  ;;  %817 = vmatprep.subr.mxu1 %v1132_v0 }
  0x7d   : > { %783 = vmatpush3.msra.mxu0 %v370_v25  ;;  %818 = vmatpush3.msra.mxu1 %v354_v26 }
  0x7e   : > { %784 = vmatprep.subr.mxu0 %v1132_v0  ;;  %819 = vmatprep.subr.mxu1 %v1132_v0 }
  0x7f   : > { %785 = vmatpush3.msra.mxu0 %v369_v27  ;;  %820 = vmatpush3.msra.mxu1 %v353_v28 }
  0x80   : > { %786 = vmatprep.subr.mxu0 %v1132_v0  ;;  %821 = vmatprep.subr.mxu1 %v1132_v0 }
  0x81   : > { %787 = vmatpush3.msra.mxu0 %v368_v29  ;;  %822 = vmatpush3.msra.mxu1 %v352_v30 }
  0x82   : > { %788 = vmatprep.subr.mxu0 %v1132_v0  ;;  %823 = vmatprep.subr.mxu1 %v1132_v0 }
  0x83   : > { %789 = vmatpush3.msra.mxu0 %v367_v31  ;;  %824 = vmatpush3.msra.mxu1 %v351_v32 }
  0x84   : > { %791 = vmatmul.mubr.f32.vlgmr.msra.gmra.mxu0 %v350_v33  ;;  %826 = vmatmul.mubr.f32.vlgmr.msra.gmra.mxu1 %v349_v34 }
 0x144   : > { %v449_v35 = vpop.f32.mrf.mxu0  ;;  %v519_v36 = vpop.f32.mrf.mxu1 }
 0x145   : > { %v520_v38 = vadd.f32 %v519_v36, %v449_v35 }
 0x146   : > { %v792_v39 = vpop.f32.mrf.mxu0  ;;  %v827_v40 = vpop.f32.mrf.mxu1 }
 0x147   : > { %v530_v41 = vadd.f32 %v718_v37, %v520_v38 }
 0x149   : > { %v719_v42 = vmul.f32 -1.442695, %v530_v41 }
 0x14b   : > { %920 = vpow2.f32 %v719_v42 }
 0x158   : > { %v921_v43 = vpop.eup %920 }
 0x159   : > { %v534_v44 = vadd.f32 1.0, %v921_v43 }
 0x15b   : > { %922 = vrcp.f32 %v534_v44 }
 0x168   : > { %v923_v46 = vpop.eup %922 }
 0x169   : > { %v544_v47 = vmul.f32 %v923_v46, %v543_v45 }
 0x16b   : > { %v545_v48 = vadd.f32 %v544_v47, %v350_v33 }
 0x16d   : > { %546 = vst [vmem:[%s344_s13] sm:$0xff] %v545_v48 }
 0x16e   : > { %1045 = shalt.err (!%p1042_p1)
}
 0x16f   : > { %s1046_s12 = scalar_lea.hbm %s560_s30, 128  ;;  %s1050_s2 = scalar_lea.hbm %s1410_s5, 256 }
 0x170   : > { %p1047_p2 = scmp.ne.s32.totalorder %s560_s30, %s1046_s12  ;;  %p1051_p11 = scmp.lt.s32.totalorder %s560_s30, %s1410_s5 }
 0x171   : > { %p1052_p0 = scmp.lt.s32.totalorder %s1050_s2, %s1046_s12 }
 0x172   : > { %p1048_p6 = pnand %p1047_p2, %p1256_p9 }
 0x173   : > { %p1053_p12 = por %p1052_p0, %p1051_p11 }
 0x174   : > { %p1049_p8 = pneg %p1048_p6 }
 0x176   : > { %p1054_p4 = pnand %p1053_p12, %p1049_p8 }
 0x178   : > { %1057 = shalt.err (!%p1054_p4)
}
 0x179   : > { %840 = dma.vmem_to_hbm [thread:$0]  (%p1256_p9), %s563_s6, 128, %s560_s30, %s548_s0  }
 0x17a PF: > { %s574_s24 = sand.u32 1, %s1104_s18   ;;  %p1429_p3 = scmp.ne.s32.totalorder %s1416_s27, 0 }
 0x17b   : > { %p1430_p7 = scmp.ge.s32.totalorder %s1124_s23, 2  ;;  %s575_s26 = scalar_lea.sflag [#allocation4], %s574_s24 }
 0x17d   : > { %p857_p13 = pnand %p1430_p7, %p1429_p3 }
 0x17f   : > { %p858_p5 = pneg %p857_p13 }
 0x181   : > { %1099 = dma.done.wait (%p858_p5), %s575_s26, 128  }
 0x182   : > { %1101 = vsyncadd (%p858_p5), %s575_s26, 4294967168  ;;  %s25_s23 = sadd.s32 1, %s1124_s23   ;;  %s1431_s18 = smov %s1108_s19 }
 0x183   : > { %p22_p10 = scmp.ge.s32.totalorder %s25_s23, 4   ;;  %s1432_s19 = smov %s1112_s20 }
 0x184   : > { %s1433_s20 = smov %s1265_s9  ;;  %s1434_s21 = smov %s1120_s22 }
 0x185   : > { %s1435_s22 = smov %s1437_s17  ;;  %24 = sbr.rel (!%p22_p10) target bundleno = 13 (0xd), region = 113 }
 0x18a   :  { %580 = vsyncpa [#allocation3], 1 }
 0x18b   :  { %582 = vsyncpa [#allocation3 + $0x1], 1 }
 0x18c   :  { %583 = vsyncpa [#allocation6], 1 }
 0x18d   :  { %585 = vsyncpa [#allocation6 + $0x1], 1 }
 0x18e   :  { %586 = vsyncpa [#allocation9], 1 }
 0x18f   :  { %587 = vsyncpa [#allocation4], 1 }
 0x190   :  { %589 = vsyncpa [#allocation4 + $0x1], 1 }

// kernel: tpu_custom_call.1
= control target key start
LH: loop header
LB: loop body
LE: loop exit
PB: predicated region body
PF: predicated region fallthrough
CT: control target
= control target key end

     0   :  { %s1405_s0 = inlined_call_operand.hbm [shape: f32[16,128], index: 0, kind: input, shape index: {}]   ;;  %s1406_s1 = inlined_call_operand.hbm [shape: f32[16,128], index: 1, kind: input, shape index: {}]   ;;  %s1407_s2 = inlined_call_operand.hbm [shape: f32[128,128], index: 2, kind: input, shape index: {}]   ;;  %s1408_s3 = inlined_call_operand.hbm [shape: f32[128,128], index: 3, kind: input, shape index: {}]   ;;  %s1409_s4 = inlined_call_operand.vmem [shape: f32[1,128], index: 4, kind: input, shape index: {}]   ;;  %s1410_s5 = inlined_call_operand.hbm [shape: f32[16,128], index: 5, kind: output, shape index: {}]  }
   0x1   :  { %1412 = sst [smem:[#allocation16_spill]] %s1405_s0 }
   0x2   :  { %1413 = sst [smem:[#allocation17_spill]] %s1406_s1 }
   0x3   :  { %1414 = sst [smem:[#allocation18_spill]] %s1407_s2 }
   0x4   :  { %10 = vsyncpa [#allocation3], 0 }
   0x5   :  { %12 = vsyncpa [#allocation3 + $0x1], 0 }
   0x6   :  { %13 = vsyncpa [#allocation6], 0 }
   0x7   :  { %15 = vsyncpa [#allocation6 + $0x1], 0 }
   0x8   :  { %16 = vsyncpa [#allocation9], 0 }
   0x9   :  { %17 = vsyncpa [#allocation4], 0 }
   0xa   :  { %19 = vsyncpa [#allocation4 + $0x1], 0  ;;  %s1165_s18 = smov 0   ;;  %s1167_s19 = smov 0  }
   0xb   :  { %s1169_s20 = smov 0   ;;  %s1171_s21 = smov 0  }
   0xc   :  { %s1173_s22 = smov 0   ;;  %s1175_s23 = smov 0  }
   0xd LB: > { %s1196_s24 = sadd.s32 4294967295, %s1124_s23   ;;  %s702_s25 = sadd.s32 4294967294, %s1124_s23   ;;  %s1124_s23 = sphi %s1175_s23, %s25_s23   ;;  %s1120_s22 = sphi %s1173_s22, %s1435_s22   ;;  %s1116_s21 = sphi %s1171_s21, %s1434_s21   ;;  %s1112_s20 = sphi %s1169_s20, %s1433_s20   ;;  %s1108_s19 = sphi %s1167_s19, %s1432_s19   ;;  %s1104_s18 = sphi %s1165_s18, %s1431_s18  }
   0xe   : > { %p57_p0 = scmp.ne.s32.totalorder %s1108_s19, %s1104_s18  ;;  %p1411_p1 = scmp.eq.s32.totalorder %s1196_s24, 0 }
   0xf   : > { %p193_p3 = scmp.eq.s32.totalorder %s702_s25, 1  ;;  %p703_p5 = scmp.ge.s32.totalorder %s1124_s23, 1 }
  0x10   : > { %p1205_p4 = por %p1411_p1, %p57_p0  ;;  %p200_p7 = scmp.lt.s32.totalorder %s1124_s23, 3 }
  0x11   : > { %p1210_p6 = por %p193_p3, %p57_p0  ;;  %s1126_s29 = smov [#allocation7]  }
  0x12   : > { %p1215_p8 = pnand %p703_p5, %p200_p7  ;;  %s214_s30 = sshll.u32 %s1126_s29, 4  ;;  %s215_s30 = int_to_ptr.vmem [resolvable:$true] %s214_s30 }
  0x13   : > { %s1416_s27 = scalar_select %p1210_p6, 1, 0 }
  0x14   : > { %p842_p9 = pneg %p1215_p8  ;;  %s1127_s7 = smov [#allocation8]  }
  0x15   : > { %s229_s8 = sshll.u32 %s1127_s7, 4  ;;  %s935_s9 = scalar_lea.vmem %s215_s30, 2048  ;;  %s230_s8 = int_to_ptr.vmem [resolvable:$true] %s229_s8 }
  0x16   : > { %p1224_p11 = pnand %p842_p9, %p1411_p1  ;;  %p936_p13 = scmp.ne.s32.totalorder %s215_s30, %s935_s9 }
  0x17   : > { %p943_p5 = scmp.lt.s32.totalorder %s215_s30, %s215_s30  ;;  %p944_p7 = scmp.lt.s32.totalorder %s935_s9, %s935_s9 }
  0x18   : > { %p926_p12 = pneg %p1224_p11 }
  0x19   : > { %p945_p10 = por %p944_p7, %p943_p5 }
  0x1a   : > { %p938_p0 = pnand %p936_p13, %p926_p12 }
  0x1c   : > { %p939_p3 = pneg %p938_p0 }
  0x1e   : > { %p946_p9 = pnand %p945_p10, %p939_p3 }
  0x20   : > { %949 = shalt.err (!%p946_p9)
}
  0x21   : > { %s1128_s10 = smov 128   ;;  %s1129_s11 = smov 8  }
  0x22   : > { %s1419_s2 = sld [smem:[#allocation18_spill]]  ;;  %s961_s14 = scalar_lea.vmem %s230_s8, 2048 }
  0x23   : > { %p962_p1 = scmp.ne.s32.totalorder %s230_s8, %s961_s14  ;;  %p969_p2 = scmp.lt.s32.totalorder %s230_s8, %s230_s8 }
  0x24   : > { %p970_p6 = scmp.lt.s32.totalorder %s961_s14, %s961_s14 }
  0x25   : > { %p964_p13 = pnand %p962_p1, %p926_p12 }
  0x26   : > { %p971_p5 = por %p970_p6, %p969_p2 }
  0x27   : > { %p965_p0 = pneg %p964_p13 }
  0x28   : > { %845 = dma.hbm_to_vmem [thread:$0]  (!%p1224_p11), %s1419_s2, 2048, %s215_s30, [#allocation6], %s1128_s10, %s1128_s10, %s1129_s11  }
  0x29   : > { %p972_p10 = pnand %p971_p5, %p965_p0 }
  0x2b   : > { %975 = shalt.err (!%p972_p10)
}
  0x2c   : > { %848 = dma.hbm_to_vmem [thread:$0]  (!%p1224_p11), %s1408_s3, 2048, %s230_s8, [#allocation9], %s1128_s10, %s1128_s10, %s1129_s11  }
  0x2d   : > { %s37_s17 = sadd.s32 1, %s1120_s22  ;;  %s44_s25 = sadd.s32 1, %s1112_s20 }
  0x2e   : > { %p39_p1 = scmp.ge.s32.totalorder %s37_s17, 2  ;;  %p51_p2 = scmp.ne.s32.totalorder %s1112_s20, %s1108_s19 }
  0x2f   : > { %p52_p6 = scmp.eq.s32.totalorder %s1124_s23, 0  ;;  %p862_p12 = scmp.lt.s32.totalorder %s1124_s23, 2 }
  0x30   : > { %s1437_s17 = smov (%p39_p1, %s37_s17), 0  ;;  %p1420_p7 = scmp.eq.s32.totalorder %s1196_s24, 1 }
  0x31   : > { %p53_p3 = por %p52_p6, %p51_p2  ;;  %s41_s30 = ssub.s32 %s1120_s22, %s1437_s17 }
  0x32   : > { %p1256_p9 = por %p1420_p7, %p51_p2  ;;  %s249_s6 = sand.u32 1, %s1112_s20  }
  0x33   : > { %p42_p13 = scmp.eq.s32.totalorder %s41_s30, 0  ;;  %s708_s7 = sshll.u32 %s249_s6, 3 }
  0x34   : > { %s709_s8 = sshll.u32 %s1120_s22, 7  ;;  %s1422_s0 = sld [smem:[#allocation16_spill]] }
  0x35   : > { %s1265_s9 = scalar_select %p42_p13, %s1112_s20, %s44_s25  }
  0x36   : > { %s253_s13 = scalar_lea.vmem [#allocation2], %s708_s7  ;;  %p1272_p11 = pnand %p862_p12, %p53_p3 }
  0x37   : > { %s260_s14 = sshll.u32 %s253_s13, 4  ;;  %s1424_s1 = sld [smem:[#allocation17_spill]]  ;;  %s261_s14 = int_to_ptr.vmem [resolvable:$true] %s260_s14 }
  0x38   : > { %s250_s25 = scalar_lea.sflag [#allocation3], %s249_s6  ;;  %p978_p0 = pneg %p1272_p11 }
  0x39   : > { %s989_s10 = scalar_lea.vmem %s261_s14, 128  ;;  %s1130_s11 = smov [#allocation2]  }
  0x3a   : > { %s258_s12 = scalar_lea.hbm %s1422_s0, %s709_s8  ;;  %p990_p5 = scmp.ne.s32.totalorder %s261_s14, %s989_s10 }
  0x3b   : > { %s994_s13 = sshll.u32 %s1130_s11, 4  ;;  %s995_s13 = int_to_ptr.vmem [resolvable:$false] %s994_s13 }
  0x3c   : > { %p992_p10 = pnand %p990_p5, %p978_p0  ;;  %s996_s0 = scalar_lea.vmem %s995_s13, 256 }
  0x3d   : > { %s1279_s2 = scalar_lea.hbm %s1424_s1, %s709_s8  ;;  %p997_p2 = scmp.lt.s32.totalorder %s261_s14, %s995_s13 }
  0x3e   : > { %p993_p1 = pneg %p992_p10  ;;  %p998_p6 = scmp.lt.s32.totalorder %s996_s0, %s989_s10 }
  0x40   : > { %p999_p12 = por %p998_p6, %p997_p2 }
  0x42   : > { %p1000_p3 = pnand %p999_p12, %p993_p1 }
  0x44   : > { %1003 = shalt.err (!%p1000_p3)
}
  0x45   : > { %852 = dma.hbm_to_vmem [thread:$0]  (!%p1272_p11), %s258_s12, 128, %s261_s14, %s250_s25  }
  0x46   : > { %s267_s6 = sand.u32 1, %s1124_s23   ;;  %s271_s8 = scalar_lea.vmem [#allocation5], %s708_s7 }
  0x47   : > { %s278_s16 = sshll.u32 %s271_s8, 4  ;;  %s268_s30 = scalar_lea.sflag [#allocation6], %s267_s6  ;;  %s279_s16 = int_to_ptr.vmem [resolvable:$true] %s278_s16 }
  0x48   : > { %s1017_s1 = scalar_lea.vmem %s279_s16, 128  ;;  %s1131_s0 = smov [#allocation5]  }
  0x49   : > { %p1018_p7 = scmp.ne.s32.totalorder %s279_s16, %s1017_s1  ;;  %s1022_s10 = sshll.u32 %s1131_s0, 4  ;;  %s1023_s10 = int_to_ptr.vmem [resolvable:$false] %s1022_s10 }
  0x4a   : > { %s1024_s11 = scalar_lea.vmem %s1023_s10, 256  ;;  %p1025_p10 = scmp.lt.s32.totalorder %s279_s16, %s1023_s10 }
  0x4b   : > { %p1020_p13 = pnand %p1018_p7, %p978_p0  ;;  %p1026_p1 = scmp.lt.s32.totalorder %s1024_s11, %s1017_s1 }
  0x4d   : > { %p1021_p5 = pneg %p1020_p13  ;;  %p1027_p2 = por %p1026_p1, %p1025_p10 }
  0x4f   : > { %p1028_p6 = pnand %p1027_p2, %p1021_p5 }
  0x51   : > { %1031 = shalt.err (!%p1028_p6)
}
  0x52   : > { %855 = dma.hbm_to_vmem [thread:$0]  (!%p1272_p11), %s1279_s2, 128, %s279_s16, %s268_s30  }
  0x53   : > { %287 = sbr.rel (%p1215_p8) target bundleno = 378 (0x17a), region = 40  ;;  %s1298_s7 = sand.u32 (!%p1215_p8), 1, %s1108_s19  }
  0x54   : > { %s1301_s12 = sshll.u32 (!%p1215_p8), %s1298_s7, 3  ;;  %s290_s1 = scalar_lea.sflag (!%p1215_p8), [#allocation3], %s1298_s7 }
  0x55   : > { %s293_s14 = scalar_lea.vmem (!%p1215_p8), [#allocation2], %s1301_s12 }
  0x58   : > { %1083 = dma.done.wait (%p1205_p4), %s290_s1, 128  }
  0x59   : > { %1085 = vsyncadd (%p1205_p4), %s290_s1, 4294967168  ;;  %s298_s2 = sand.u32 1, %s1196_s24   ;;  %s302_s15 = scalar_lea.vmem [#allocation5], %s1301_s12 }
  0x5a   : > { %s299_s28 = scalar_lea.sflag [#allocation6], %s298_s2 }
  0x5b   : > { %1087 = dma.done.wait (%p1205_p4), %s299_s28, 128  }
  0x5c   : > { %1089 = vsyncadd (%p1205_p4), %s299_s28, 4294967168  ;;  %p1425_p8 = scmp.eq.s32.totalorder %s1196_s24, 0 }
  0x5e   : > { %1091 = dma.done.wait (%p1425_p8), [#allocation6], 2048   ;;  %p1426_p11 = pmov %p1425_p8 }
  0x5f   : > { %p1427_p0 = pmov %p1425_p8 }
  0x60   : > { %1093 = vsyncadd (%p1426_p11), [#allocation6], 4294965248 }
  0x61   : > { %1095 = dma.done.wait (%p1427_p0), [#allocation9], 2048   ;;  %p1428_p12 = pmov %p1427_p0 }
  0x62   : > { %v1132_v0 = vmov 0.0   ;;  %vm1133_vm0 = vmmov 0   ;;  %v382_v1 = vld [vmem:[#allocation8 + $0x78] sm:$0xff]  ;;  %v381_v3 = vld [vmem:[#allocation8 + $0x70] sm:$0xff]  ;;  %v380_v5 = vld [vmem:[#allocation8 + $0x68] sm:$0xff]  ;;  %s721_s25 = sshll.u32 %s1116_s21, 7 }
  0x63   : > { %1097 = vsyncadd (%p1428_p12), [#allocation9], 4294965248  ;;  %758 = vmatprep.subr.mxu0 %v1132_v0  ;;  %793 = vmatprep.subr.mxu1 %v1132_v0  ;;  %v366_v2 = vld [vmem:[#allocation7 + $0x78] sm:$0xff]  ;;  %v365_v4 = vld [vmem:[#allocation7 + $0x70] sm:$0xff]  ;;  %s344_s13 = scalar_lea.vmem [#allocation10], %s1301_s12  ;;  %s560_s30 = scalar_lea.hbm %s1410_s5, %s721_s25 }
  0x64   : > { %790 = vmatprep.mubr.msk.f32.mxu0 %vm1133_vm0, %v1132_v0  ;;  %825 = vmatprep.mubr.msk.f32.mxu1 %vm1133_vm0, %v1132_v0  ;;  %v364_v6 = vld [vmem:[#allocation7 + $0x68] sm:$0xff]  ;;  %v379_v7 = vld [vmem:[#allocation8 + $0x60] sm:$0xff]  ;;  %v378_v9 = vld [vmem:[#allocation8 + $0x58] sm:$0xff]  ;;  %s562_s6 = sshll.u32 %s344_s13, 4  ;;  %s548_s0 = scalar_lea.sflag [#allocation4], %s1298_s7  ;;  %s563_s6 = int_to_ptr.vmem [resolvable:$true] %s562_s6 }
  0x65   : > { %759 = vmatpush3.msra.mxu0 %v382_v1  ;;  %794 = vmatpush3.msra.mxu1 %v366_v2  ;;  %v363_v8 = vld [vmem:[#allocation7 + $0x60] sm:$0xff]  ;;  %v362_v10 = vld [vmem:[#allocation7 + $0x58] sm:$0xff]  ;;  %v377_v11 = vld [vmem:[#allocation8 + $0x50] sm:$0xff]  ;;  %s1032_s10 = scalar_lea.vmem %s563_s6, 128  ;;  %s1134_s11 = smov [#allocation10]  }
  0x66   : > { %760 = vmatprep.subr.mxu0 %v1132_v0  ;;  %795 = vmatprep.subr.mxu1 %v1132_v0  ;;  %v361_v12 = vld [vmem:[#allocation7 + $0x50] sm:$0xff]  ;;  %v376_v13 = vld [vmem:[#allocation8 + $0x48] sm:$0xff]  ;;  %v375_v15 = vld [vmem:[#allocation8 + $0x40] sm:$0xff]  ;;  %p1033_p4 = scmp.ne.s32.totalorder %s563_s6, %s1032_s10  ;;  %s1036_s1 = sshll.u32 %s1134_s11, 4  ;;  %s1037_s1 = int_to_ptr.vmem [resolvable:$false] %s1036_s1 }
  0x67   : > { %761 = vmatpush3.msra.mxu0 %v381_v3  ;;  %796 = vmatpush3.msra.mxu1 %v365_v4  ;;  %v360_v14 = vld [vmem:[#allocation7 + $0x48] sm:$0xff]  ;;  %v359_v16 = vld [vmem:[#allocation7 + $0x40] sm:$0xff]  ;;  %v374_v17 = vld [vmem:[#allocation8 + $0x38] sm:$0xff]  ;;  %s1038_s21 = scalar_lea.vmem %s1037_s1, 256  ;;  %p1039_p13 = scmp.lt.s32.totalorder %s563_s6, %s1037_s1 }
  0x68   : > { %762 = vmatprep.subr.mxu0 %v1132_v0  ;;  %797 = vmatprep.subr.mxu1 %v1132_v0  ;;  %v358_v18 = vld [vmem:[#allocation7 + $0x38] sm:$0xff]  ;;  %v373_v19 = vld [vmem:[#allocation8 + $0x30] sm:$0xff]  ;;  %v372_v21 = vld [vmem:[#allocation8 + $0x28] sm:$0xff]  ;;  %p1034_p3 = pnand %p1033_p4, %p1256_p9  ;;  %p1040_p5 = scmp.lt.s32.totalorder %s1038_s21, %s1032_s10 }
  0x69   : > { %763 = vmatpush3.msra.mxu0 %v380_v5  ;;  %798 = vmatpush3.msra.mxu1 %v364_v6  ;;  %v357_v20 = vld [vmem:[#allocation7 + $0x30] sm:$0xff]  ;;  %v356_v22 = vld [vmem:[#allocation7 + $0x28] sm:$0xff]  ;;  %v371_v23 = vld [vmem:[#allocation8 + $0x20] sm:$0xff] }
  0x6a   : > { %764 = vmatprep.subr.mxu0 %v1132_v0  ;;  %799 = vmatprep.subr.mxu1 %v1132_v0  ;;  %v355_v24 = vld [vmem:[#allocation7 + $0x20] sm:$0xff]  ;;  %v370_v25 = vld [vmem:[#allocation8 + $0x18] sm:$0xff]  ;;  %v369_v27 = vld [vmem:[#allocation8 + $0x10] sm:$0xff]  ;;  %p1035_p7 = pneg %p1034_p3  ;;  %p1041_p10 = por %p1040_p5, %p1039_p13 }
  0x6b   : > { %765 = vmatpush3.msra.mxu0 %v379_v7  ;;  %800 = vmatpush3.msra.mxu1 %v363_v8  ;;  %v354_v26 = vld [vmem:[#allocation7 + $0x18] sm:$0xff]  ;;  %v353_v28 = vld [vmem:[#allocation7 + $0x10] sm:$0xff]  ;;  %v368_v29 = vld [vmem:[#allocation8 + $0x8] sm:$0xff] }
  0x6c   : > { %766 = vmatprep.subr.mxu0 %v1132_v0  ;;  %801 = vmatprep.subr.mxu1 %v1132_v0  ;;  %v352_v30 = vld [vmem:[#allocation7 + $0x8] sm:$0xff]  ;;  %v367_v31 = vld [vmem:[#allocation8] sm:$0xff]  ;;  %v350_v33 = vld [vmem:[%s302_s15] sm:$0xff]  ;;  %p1042_p1 = pnand %p1041_p10, %p1035_p7 }
  0x6d   : > { %767 = vmatpush3.msra.mxu0 %v378_v9  ;;  %802 = vmatpush3.msra.mxu1 %v362_v10  ;;  %v351_v32 = vld [vmem:[#allocation7] sm:$0xff] }
  0x6e   : > { %768 = vmatprep.subr.mxu0 %v1132_v0  ;;  %803 = vmatprep.subr.mxu1 %v1132_v0  ;;  %v349_v34 = vld [vmem:[%s293_s14] sm:$0xff] }
  0x6f   : > { %769 = vmatpush3.msra.mxu0 %v377_v11  ;;  %804 = vmatpush3.msra.mxu1 %v361_v12  ;;  %v718_v37 = vld [vmem:[%s1409_s4] ss:$0 sm:$0xff]  ;;  %v543_v45 = vsub.f32 %v349_v34, %v350_v33 }
  0x70   : > { %770 = vmatprep.subr.mxu0 %v1132_v0  ;;  %805 = vmatprep.subr.mxu1 %v1132_v0 }
  0x71   : > { %771 = vmatpush3.msra.mxu0 %v376_v13  ;;  %806 = vmatpush3.msra.mxu1 %v360_v14 }
  0x72   : > { %772 = vmatprep.subr.mxu0 %v1132_v0  ;;  %807 = vmatprep.subr.mxu1 %v1132_v0 }
  0x73   : > { %773 = vmatpush3.msra.mxu0 %v375_v15  ;;  %808 = vmatpush3.msra.mxu1 %v359_v16 }
  0x74   : > { %774 = vmatprep.subr.mxu0 %v1132_v0  ;;  %809 = vmatprep.subr.mxu1 %v1132_v0 }
  0x75   : > { %775 = vmatpush3.msra.mxu0 %v374_v17  ;;  %810 = vmatpush3.msra.mxu1 %v358_v18 }
  0x76   : > { %776 = vmatprep.subr.mxu0 %v1132_v0  ;;  %811 = vmatprep.subr.mxu1 %v1132_v0 }
  0x77   : > { %777 = vmatpush3.msra.mxu0 %v373_v19  ;;  %812 = vmatpush3.msra.mxu1 %v357_v20 }
  0x78   : > { %778 = vmatprep.subr.mxu0 %v1132_v0  ;;  %813 = vmatprep.subr.mxu1 %v1132_v0 }
  0x79   : > { %779 = vmatpush3.msra.mxu0 %v372_v21  ;;  %814 = vmatpush3.msra.mxu1 %v356_v22 }
  0x7a   : > { %780 = vmatprep.subr.mxu0 %v1132_v0  ;;  %815 = vmatprep.subr.mxu1 %v1132_v0 }
  0x7b   : > { %781 = vmatpush3.msra.mxu0 %v371_v23  ;;  %816 = vmatpush3.msra.mxu1 %v355_v24 }
  0x7c   : > { %782 = vmatprep.subr.mxu0 %v1132_v0  ;;  %817 = vmatprep.subr.mxu1 %v1132_v0 }
  0x7d   : > { %783 = vmatpush3.msra.mxu0 %v370_v25  ;;  %818 = vmatpush3.msra.mxu1 %v354_v26 }
  0x7e   : > { %784 = vmatprep.subr.mxu0 %v1132_v0  ;;  %819 = vmatprep.subr.mxu1 %v1132_v0 }
  0x7f   : > { %785 = vmatpush3.msra.mxu0 %v369_v27  ;;  %820 = vmatpush3.msra.mxu1 %v353_v28 }
  0x80   : > { %786 = vmatprep.subr.mxu0 %v1132_v0  ;;  %821 = vmatprep.subr.mxu1 %v1132_v0 }
  0x81   : > { %787 = vmatpush3.msra.mxu0 %v368_v29  ;;  %822 = vmatpush3.msra.mxu1 %v352_v30 }
  0x82   : > { %788 = vmatprep.subr.mxu0 %v1132_v0  ;;  %823 = vmatprep.subr.mxu1 %v1132_v0 }
  0x83   : > { %789 = vmatpush3.msra.mxu0 %v367_v31  ;;  %824 = vmatpush3.msra.mxu1 %v351_v32 }
  0x84   : > { %791 = vmatmul.mubr.f32.vlgmr.msra.gmra.mxu0 %v350_v33  ;;  %826 = vmatmul.mubr.f32.vlgmr.msra.gmra.mxu1 %v349_v34 }
 0x144   : > { %v449_v35 = vpop.f32.mrf.mxu0  ;;  %v519_v36 = vpop.f32.mrf.mxu1 }
 0x145   : > { %v520_v38 = vadd.f32 %v519_v36, %v449_v35 }
 0x146   : > { %v792_v39 = vpop.f32.mrf.mxu0  ;;  %v827_v40 = vpop.f32.mrf.mxu1 }
 0x147   : > { %v530_v41 = vadd.f32 %v718_v37, %v520_v38 }
 0x149   : > { %v719_v42 = vmul.f32 -1.442695, %v530_v41 }
 0x14b   : > { %920 = vpow2.f32 %v719_v42 }
 0x158   : > { %v921_v43 = vpop.eup %920 }
 0x159   : > { %v534_v44 = vadd.f32 1.0, %v921_v43 }
 0x15b   : > { %922 = vrcp.f32 %v534_v44 }
 0x168   : > { %v923_v46 = vpop.eup %922 }
 0x169   : > { %v544_v47 = vmul.f32 %v923_v46, %v543_v45 }
 0x16b   : > { %v545_v48 = vadd.f32 %v544_v47, %v350_v33 }
 0x16d   : > { %546 = vst [vmem:[%s344_s13] sm:$0xff] %v545_v48 }
 0x16e   : > { %1045 = shalt.err (!%p1042_p1)
}
 0x16f   : > { %s1046_s12 = scalar_lea.hbm %s560_s30, 128  ;;  %s1050_s2 = scalar_lea.hbm %s1410_s5, 256 }
 0x170   : > { %p1047_p2 = scmp.ne.s32.totalorder %s560_s30, %s1046_s12  ;;  %p1051_p11 = scmp.lt.s32.totalorder %s560_s30, %s1410_s5 }
 0x171   : > { %p1052_p0 = scmp.lt.s32.totalorder %s1050_s2, %s1046_s12 }
 0x172   : > { %p1048_p6 = pnand %p1047_p2, %p1256_p9 }
 0x173   : > { %p1053_p12 = por %p1052_p0, %p1051_p11 }
 0x174   : > { %p1049_p8 = pneg %p1048_p6 }
 0x176   : > { %p1054_p4 = pnand %p1053_p12, %p1049_p8 }
 0x178   : > { %1057 = shalt.err (!%p1054_p4)
}
 0x179   : > { %840 = dma.vmem_to_hbm [thread:$0]  (%p1256_p9), %s563_s6, 128, %s560_s30, %s548_s0  }
 0x17a PF: > { %s574_s24 = sand.u32 1, %s1104_s18   ;;  %p1429_p3 = scmp.ne.s32.totalorder %s1416_s27, 0 }
 0x17b   : > { %p1430_p7 = scmp.ge.s32.totalorder %s1124_s23, 2  ;;  %s575_s26 = scalar_lea.sflag [#allocation4], %s574_s24 }
 0x17d   : > { %p857_p13 = pnand %p1430_p7, %p1429_p3 }
 0x17f   : > { %p858_p5 = pneg %p857_p13 }
 0x181   : > { %1099 = dma.done.wait (%p858_p5), %s575_s26, 128  }
 0x182   : > { %1101 = vsyncadd (%p858_p5), %s575_s26, 4294967168  ;;  %s25_s23 = sadd.s32 1, %s1124_s23   ;;  %s1431_s18 = smov %s1108_s19 }
 0x183   : > { %p22_p10 = scmp.ge.s32.totalorder %s25_s23, 4   ;;  %s1432_s19 = smov %s1112_s20 }
 0x184   : > { %s1433_s20 = smov %s1265_s9  ;;  %s1434_s21 = smov %s1120_s22 }
 0x185   : > { %s1435_s22 = smov %s1437_s17  ;;  %24 = sbr.rel (!%p22_p10) target bundleno = 13 (0xd), region = 113 }
 0x18a   :  { %580 = vsyncpa [#allocation3], 1 }
 0x18b   :  { %582 = vsyncpa [#allocation3 + $0x1], 1 }
 0x18c   :  { %583 = vsyncpa [#allocation6], 1 }
 0x18d   :  { %585 = vsyncpa [#allocation6 + $0x1], 1 }
 0x18e   :  { %586 = vsyncpa [#allocation9], 1 }
 0x18f   :  { %587 = vsyncpa [#allocation4], 1 }
 0x190   :  { %589 = vsyncpa [#allocation4 + $0x1], 1 }

</bundles_post_ra>
